<compile_context>
chip_gen: v6e
topology: v6e:2x2x1
jax: 0.10.0
libtpu: 0.0.40
codegen_flags: <defaults>
</compile_context>

<pallas_src>
import functools

import jax
import jax.numpy as jnp
from jax.experimental import pallas as pl
from jax.experimental.pallas import tpu as pltpu

IN_FEATURES = 4
K_PAD = 8              # layer-1 contraction padded to 8 (MXU path, cheap DMA)
HIDDEN_LAYER_1 = 128
HIDDEN_LAYER_2 = 128
OUT_FEATURES = 2
OUT_PAD = 128          # lane-dense width for the layer-3 MXU result / bias add
LANE = 128
DEFAULT_TM = 8192      # batch-tile rows (always a multiple of 128)


def _round_up(n, m):
    return ((n + m - 1) // m) * m


def _cdiv(a, b):
    return (a + b - 1) // b


def _pick_tile(batch, max_tm=DEFAULT_TM):
    """Pick (TM, padded_batch).  TM is a multiple of 128; once the padded
    batch exceeds one tile we force >= 2 grid steps (v7x megacore)."""
    b128 = _round_up(max(batch, 1), LANE)
    if b128 <= LANE:
        # Tiny batch: one 128-row tile; the per-call fixed cost dominates
        # anyway, and 128 rows of this MLP are essentially free.
        return LANE, LANE
    n_tiles = max(2, _cdiv(b128, max_tm))
    tm = min(max_tm, _round_up(_cdiv(b128, n_tiles), LANE))
    bp = _round_up(batch, tm)
    return tm, bp


def mlp_kernel(x_ref, w1_ref, b1_ref, w2_ref, b2_ref, w3_ref, b3_ref, o_ref):
    # ---- Layer 1 on the MXU: K zero-padded to 8, bf16 operands, f32 acc. ----
    h1 = jnp.dot(x_ref[...], w1_ref[...],
                 preferred_element_type=jnp.float32)          # (TM, 128) f32
    h1 = jnp.maximum(h1 + b1_ref[...], 0.0)

    # ---- Layer 2 on the MXU. -------------------------------------------------
    h2 = jnp.dot(h1.astype(jnp.bfloat16), w2_ref[...],
                 preferred_element_type=jnp.float32)          # (TM, 128) f32
    h2 = jnp.maximum(h2 + b2_ref[...], 0.0)

    # ---- Layer 3 on the MXU at lane-dense N=128 (w3 & b3 zero-padded). ------
    h3 = jnp.dot(h2.astype(jnp.bfloat16), w3_ref[...],
                 preferred_element_type=jnp.float32)          # (TM, 128) f32
    h3 = h3 + b3_ref[...]                                     # dense bias add

    # Transpose on the (mostly idle) XLU while dims are (8,128)-aligned, then
    # slice to the 2 real rows -> the store is lane-dense (2, TM) unmasked vst
    # instead of TM/8 masked vst.msk; HBM writeback stays 8 B/row.
    o_ref[...] = h3.T[:OUT_FEATURES, :].astype(o_ref.dtype)   # (2, TM)


def network_forward(x, params, *, block_rows=DEFAULT_TM):
    """x: (B, 4) float32. params: dict of w1,b1,w2,b2,w3,b3 (as init_params)."""
    B = x.shape[0]
    TM, Bp = _pick_tile(B, block_rows)

    # Input: pad rows to Bp, features to K_PAD=8, cast once to bf16 (16 B/row).
    x_p = jnp.pad(x, ((0, Bp - B), (0, K_PAD - IN_FEATURES))).astype(jnp.bfloat16)

    # One-time weight preparation (outside the kernel / grid loop).
    w1 = jnp.pad(params["w1"], ((0, K_PAD - IN_FEATURES), (0, 0)))
    w1 = w1.astype(jnp.bfloat16)                     # (8, 128)
    b1 = params["b1"].astype(jnp.float32)            # (1, 128)
    w2 = params["w2"].astype(jnp.bfloat16)           # (128, 128)
    b2 = params["b2"].astype(jnp.float32)            # (1, 128)
    w3 = jnp.pad(params["w3"], ((0, 0), (0, OUT_PAD - OUT_FEATURES)))
    w3 = w3.astype(jnp.bfloat16)                     # (128, 128)
    b3 = jnp.pad(params["b3"], ((0, 0), (0, OUT_PAD - OUT_FEATURES)))
    b3 = b3.astype(jnp.float32)                      # (1, 128)

    grid = (Bp // TM,)

    const2d = lambda a: pl.BlockSpec(a.shape, lambda i: (0, 0))

    flops = 2 * Bp * (K_PAD * HIDDEN_LAYER_1
                      + HIDDEN_LAYER_1 * HIDDEN_LAYER_2
                      + HIDDEN_LAYER_2 * OUT_FEATURES)
    bytes_accessed = (Bp * K_PAD * 2 + Bp * OUT_FEATURES * 4
                      + w1.size * 2 + b1.size * 4
                      + w2.size * 2 + b2.size * 4
                      + w3.size * 2 + b3.size * 4)

    out_t = pl.pallas_call(
        mlp_kernel,
        out_shape=jax.ShapeDtypeStruct((OUT_FEATURES, Bp), jnp.float32),
        grid=grid,
        in_specs=[
            pl.BlockSpec((TM, K_PAD), lambda i: (i, 0)),   # x: tiled rows
            const2d(w1), const2d(b1),                      # weights: resident
            const2d(w2), const2d(b2),
            const2d(w3), const2d(b3),
        ],
        out_specs=pl.BlockSpec((OUT_FEATURES, TM), lambda i: (0, i)),
        compiler_params=pltpu.CompilerParams(
            dimension_semantics=("parallel",),
            vmem_limit_bytes=48 * 1024 * 1024),
        cost_estimate=pl.CostEstimate(
            flops=int(flops), transcendentals=0,
            bytes_accessed=int(bytes_accessed)),
    )(x_p, w1, b1, w2, b2, w3, b3)

    # Un-transpose / un-pad in the wrapper (plain XLA, negligible).
    return out_t[:, :B].T


def init_params(key):
    """Deterministic init mimicking nn.Linear's uniform(-1/sqrt(fan_in), ...)."""
    ks = jax.random.split(key, 6)

    def linear(kw, kb, fan_in, fan_out):
        bound = 1.0 / jnp.sqrt(float(fan_in))
        # stored as (in, out) so the kernel computes x @ W
        w = jax.random.uniform(kw, (fan_in, fan_out), jnp.float32, -bound, bound)
        b = jax.random.uniform(kb, (1, fan_out), jnp.float32, -bound, bound)
        return w, b

    w1, b1 = linear(ks[0], ks[1], IN_FEATURES, HIDDEN_LAYER_1)
    w2, b2 = linear(ks[2], ks[3], HIDDEN_LAYER_1, HIDDEN_LAYER_2)
    w3, b3 = linear(ks[4], ks[5], HIDDEN_LAYER_2, OUT_FEATURES)
    return {"w1": w1, "b1": b1, "w2": w2, "b2": b2, "w3": w3, "b3": b3}


def reference_forward(x, p):
    """Pure-f32 reference matching the PyTorch module."""
    h = jnp.maximum(x @ p["w1"] + p["b1"], 0.0)
    h = jnp.maximum(h @ p["w2"] + p["b2"], 0.0)
    return h @ p["w3"] + p["b3"]


if __name__ == "__main__":
    key = jax.random.PRNGKey(0)
    k_param, k_x = jax.random.split(key)

    params = init_params(k_param)
    x = jax.random.normal(k_x, (8, IN_FEATURES), jnp.float32)   # batch=8, features=4

    fwd = jax.jit(functools.partial(network_forward, params=params))
    out = jax.block_until_ready(fwd(x))

    ref = reference_forward(x, params)
    assert out.shape == (8, OUT_FEATURES), out.shape
    # bf16 operands on the MXU (f32 accumulation) -> tolerance reflects bf16.
    assert jnp.allclose(out, ref, atol=5e-2, rtol=5e-2), (
        float(jnp.max(jnp.abs(out - ref))))

    print("KERNEL_OK")
</pallas_src>

<mosaic_0001>
module attributes {stable_mosaic.version = 11 : i64} {
  func.func @mlp_kernel(%arg0: i32, %arg1: memref<128x8xbf16, #tpu.memory_space<vmem>>, %arg2: memref<8x128xbf16, #tpu.memory_space<vmem>>, %arg3: memref<1x128xf32, #tpu.memory_space<vmem>>, %arg4: memref<128x128xbf16, #tpu.memory_space<vmem>>, %arg5: memref<1x128xf32, #tpu.memory_space<vmem>>, %arg6: memref<128x128xbf16, #tpu.memory_space<vmem>>, %arg7: memref<1x128xf32, #tpu.memory_space<vmem>>, %arg8: memref<2x128xf32, #tpu.memory_space<vmem>>) attributes {dimension_semantics = [#tpu.dimension_semantics<parallel>], iteration_bounds = array<i64: 1>, scalar_prefetch = 0 : i64, scratch_operands = 0 : i64, tpu.core_type = #tpu.core_type<tc>, window_params = [{transform_indices = @transform_0, window_bounds = array<i64: 128, 8>}, {pipeline_mode = #tpu.pipeline_mode<synchronous>, transform_indices = @transform_1, window_bounds = array<i64: 8, 128>}, {pipeline_mode = #tpu.pipeline_mode<synchronous>, transform_indices = @transform_2, window_bounds = array<i64: 1, 128>}, {pipeline_mode = #tpu.pipeline_mode<synchronous>, transform_indices = @transform_3, window_bounds = array<i64: 128, 128>}, {pipeline_mode = #tpu.pipeline_mode<synchronous>, transform_indices = @transform_4, window_bounds = array<i64: 1, 128>}, {pipeline_mode = #tpu.pipeline_mode<synchronous>, transform_indices = @transform_5, window_bounds = array<i64: 128, 128>}, {pipeline_mode = #tpu.pipeline_mode<synchronous>, transform_indices = @transform_6, window_bounds = array<i64: 1, 128>}, {transform_indices = @transform_7, window_bounds = array<i64: 2, 128>}]} {
    %c0 = arith.constant 0 : index
    %c0_0 = arith.constant 0 : index
    %0 = vector.load %arg1[%c0, %c0_0] : memref<128x8xbf16, #tpu.memory_space<vmem>>, vector<128x8xbf16>
    %c0_1 = arith.constant 0 : index
    %c0_2 = arith.constant 0 : index
    %1 = vector.load %arg2[%c0_1, %c0_2] : memref<8x128xbf16, #tpu.memory_space<vmem>>, vector<8x128xbf16>
    %cst = arith.constant dense<0.000000e+00> : vector<128x128xf32>
    %2 = tpu.matmul %0, %1, %cst {dimension_numbers = #tpu.dot_dimension_numbers<[1], [0], [0], [1], [0, 0, 1, 1], [], []>} : vector<128x8xbf16>, vector<8x128xbf16>, vector<128x128xf32> -> vector<128x128xf32>
    %c0_3 = arith.constant 0 : index
    %c0_4 = arith.constant 0 : index
    %3 = vector.load %arg3[%c0_3, %c0_4] : memref<1x128xf32, #tpu.memory_space<vmem>>, vector<1x128xf32>
    %4 = vector.broadcast %3 : vector<1x128xf32> to vector<128x128xf32>
    %5 = arith.addf %2, %4 : vector<128x128xf32>
    %cst_5 = arith.constant 0.000000e+00 : f32
    %6 = vector.broadcast %cst_5 : f32 to vector<128x128xf32>
    %7 = arith.maximumf %5, %6 : vector<128x128xf32>
    %8 = arith.truncf %7 : vector<128x128xf32> to vector<128x128xbf16>
    %c0_6 = arith.constant 0 : index
    %c0_7 = arith.constant 0 : index
    %9 = vector.load %arg4[%c0_6, %c0_7] : memref<128x128xbf16, #tpu.memory_space<vmem>>, vector<128x128xbf16>
    %cst_8 = arith.constant dense<0.000000e+00> : vector<128x128xf32>
    %10 = tpu.matmul %8, %9, %cst_8 {dimension_numbers = #tpu.dot_dimension_numbers<[1], [0], [0], [1], [0, 0, 1, 1], [], []>} : vector<128x128xbf16>, vector<128x128xbf16>, vector<128x128xf32> -> vector<128x128xf32>
    %c0_9 = arith.constant 0 : index
    %c0_10 = arith.constant 0 : index
    %11 = vector.load %arg5[%c0_9, %c0_10] : memref<1x128xf32, #tpu.memory_space<vmem>>, vector<1x128xf32>
    %12 = vector.broadcast %11 : vector<1x128xf32> to vector<128x128xf32>
    %13 = arith.addf %10, %12 : vector<128x128xf32>
    %cst_11 = arith.constant 0.000000e+00 : f32
    %14 = vector.broadcast %cst_11 : f32 to vector<128x128xf32>
    %15 = arith.maximumf %13, %14 : vector<128x128xf32>
    %16 = arith.truncf %15 : vector<128x128xf32> to vector<128x128xbf16>
    %c0_12 = arith.constant 0 : index
    %c0_13 = arith.constant 0 : index
    %17 = vector.load %arg6[%c0_12, %c0_13] : memref<128x128xbf16, #tpu.memory_space<vmem>>, vector<128x128xbf16>
    %cst_14 = arith.constant dense<0.000000e+00> : vector<128x128xf32>
    %18 = tpu.matmul %16, %17, %cst_14 {dimension_numbers = #tpu.dot_dimension_numbers<[1], [0], [0], [1], [0, 0, 1, 1], [], []>} : vector<128x128xbf16>, vector<128x128xbf16>, vector<128x128xf32> -> vector<128x128xf32>
    %c0_15 = arith.constant 0 : index
    %c0_16 = arith.constant 0 : index
    %19 = vector.load %arg7[%c0_15, %c0_16] : memref<1x128xf32, #tpu.memory_space<vmem>>, vector<1x128xf32>
    %20 = vector.broadcast %19 : vector<1x128xf32> to vector<128x128xf32>
    %21 = arith.addf %18, %20 : vector<128x128xf32>
    %22 = tpu.transpose %21, [1, 0] : vector<128x128xf32> -> vector<128x128xf32>
    %23 = vector.extract_strided_slice %22 {offsets = [0, 0], sizes = [2, 128], strides = [1, 1]} : vector<128x128xf32> to vector<2x128xf32>
    %c0_17 = arith.constant 0 : index
    %c0_18 = arith.constant 0 : index
    %24 = vector.load %arg8[%c0_17, %c0_18] : memref<2x128xf32, #tpu.memory_space<vmem>>, vector<2x128xf32>
    tpu.vector_store %arg8[%c0_17, %c0_18], %23 {strides = array<i32>} : memref<2x128xf32, #tpu.memory_space<vmem>>, vector<2x128xf32>,
    return
  }
  func.func @transform_0(%arg0: i32) -> (i32, i32) {
    %c0_i32 = arith.constant 0 : i32
    %c0_i32_0 = arith.constant 0 : i32
    return %arg0, %c0_i32 : i32, i32
  }
  func.func @transform_1(%arg0: i32) -> (i32, i32) {
    %c0_i32 = arith.constant 0 : i32
    %c0_i32_0 = arith.constant 0 : i32
    %c0_i32_1 = arith.constant 0 : i32
    return %c0_i32, %c0_i32_0 : i32, i32
  }
  func.func @transform_2(%arg0: i32) -> (i32, i32) {
    %c0_i32 = arith.constant 0 : i32
    %c0_i32_0 = arith.constant 0 : i32
    %c0_i32_1 = arith.constant 0 : i32
    return %c0_i32, %c0_i32_0 : i32, i32
  }
  func.func @transform_3(%arg0: i32) -> (i32, i32) {
    %c0_i32 = arith.constant 0 : i32
    %c0_i32_0 = arith.constant 0 : i32
    %c0_i32_1 = arith.constant 0 : i32
    return %c0_i32, %c0_i32_0 : i32, i32
  }
  func.func @transform_4(%arg0: i32) -> (i32, i32) {
    %c0_i32 = arith.constant 0 : i32
    %c0_i32_0 = arith.constant 0 : i32
    %c0_i32_1 = arith.constant 0 : i32
    return %c0_i32, %c0_i32_0 : i32, i32
  }
  func.func @transform_5(%arg0: i32) -> (i32, i32) {
    %c0_i32 = arith.constant 0 : i32
    %c0_i32_0 = arith.constant 0 : i32
    %c0_i32_1 = arith.constant 0 : i32
    return %c0_i32, %c0_i32_0 : i32, i32
  }
  func.func @transform_6(%arg0: i32) -> (i32, i32) {
    %c0_i32 = arith.constant 0 : i32
    %c0_i32_0 = arith.constant 0 : i32
    %c0_i32_1 = arith.constant 0 : i32
    return %c0_i32, %c0_i32_0 : i32, i32
  }
  func.func @transform_7(%arg0: i32) -> (i32, i32) {
    %c0_i32 = arith.constant 0 : i32
    %c0_i32_0 = arith.constant 0 : i32
    return %c0_i32, %arg0 : i32, i32
  }
}

</mosaic_0001>

<bundles_post_ra>
// kernel: network_forward.1
= control target key start
LH: loop header
LB: loop body
LE: loop exit
PB: predicated region body
PF: predicated region fallthrough
CT: control target
= control target key end

     0   :  { %12 = vsyncpa [#allocation3], 0  ;;  %s861_s24 = smov [#allocation2]   ;;  %s978_s0 = inlined_call_operand.vmem [shape: bf16[128,8], index: 0, kind: input, shape index: {}]   ;;  %s979_s1 = inlined_call_operand.vmem [shape: bf16[8,128], index: 1, kind: input, shape index: {}]   ;;  %s980_s2 = inlined_call_operand.vmem [shape: f32[1,128], index: 2, kind: input, shape index: {}]   ;;  %s981_s3 = inlined_call_operand.hbm [shape: bf16[128,128], index: 3, kind: input, shape index: {}]   ;;  %s982_s4 = inlined_call_operand.vmem [shape: f32[1,128], index: 4, kind: input, shape index: {}]   ;;  %s983_s5 = inlined_call_operand.vmem [shape: bf16[128,128], index: 5, kind: input, shape index: {}]   ;;  %s984_s6 = inlined_call_operand.vmem [shape: f32[1,128], index: 6, kind: input, shape index: {}]   ;;  %s985_s7 = inlined_call_operand.vmem [shape: f32[2,128], index: 7, kind: output, shape index: {}]  }
   0x1   :  { %s24_s25 = sshll.u32 %s861_s24, 4  ;;  %s25_s25 = int_to_ptr.vmem [resolvable:$true] %s24_s25 }
   0x2   :  { %s847_s26 = scalar_lea.vmem %s25_s25, 1024  ;;  %p852_p1 = scmp.lt.s32.totalorder %s25_s25, %s25_s25 }
   0x3   :  { %p848_p0 = scmp.ne.s32.totalorder %s25_s25, %s847_s26  ;;  %p853_p2 = scmp.lt.s32.totalorder %s847_s26, %s847_s26 }
   0x5   :  { %p854_p3 = por %p853_p2, %p852_p1 }
   0x7   :  { %p855_p4 = pnand %p854_p3, %p848_p0 }
   0x9   :  { %858 = shalt.err (!%p855_p4)
}
   0xa   :  { %s862_s27 = smov 64   ;;  %s863_s28 = smov 4  }
   0xb   :  { %30 = dma.hbm_to_vmem [thread:$0]  %s981_s3, 1024, %s25_s25, [#allocation3], %s862_s27, %s862_s27, %s863_s28  }
   0xc   :  { %859 = dma.done.wait [#allocation3], 1024  }
   0xd   :  { %860 = vsyncadd [#allocation3], 4294966272  ;;  %vm130_vm0 = vcmask 1043456   ;;  %vm105_vm1 = vcmask 64512   ;;  %v57_v0 = vld [vmem:[%s979_s1] sm:$0xf] }
   0xe   :  { %811 = vmatprep.subr.msk.bf16.mxu0 %vm130_vm0, %v57_v0  ;;  %v132_v1 = vsel %vm130_vm0, %v57_v0, 0  ;;  %v815_v2 = vld [vmem:[%s978_s0] sm:$0xff]   ;;  %v816_v3 = vld [vmem:[%s978_s0 + $0x8] sm:$0xff]   ;;  %v817_v4 = vld [vmem:[%s978_s0 + $0x10] sm:$0xff]  }
   0xf   :  { %730 = vmatpush3.bf16.msra.mxu0 %v132_v1  ;;  %731 = vmatprep.mubr.msk.bf16.mxu0 %vm105_vm1, %v815_v2  ;;  %v818_v5 = vld [vmem:[%s978_s0 + $0x18] sm:$0xff]   ;;  %v819_v6 = vld [vmem:[%s978_s0 + $0x20] sm:$0xff]   ;;  %v824_v8 = vld [vmem:[#allocation2 + $0x30] sm:$0xff]  }
  0x10   :  { %v823_v7 = vld [vmem:[#allocation2 + $0x38] sm:$0xff]   ;;  %v825_v9 = vld [vmem:[#allocation2 + $0x28] sm:$0xff]   ;;  %v826_v11 = vld [vmem:[#allocation2 + $0x20] sm:$0xff]  }
  0x11   :  { %747 = vmatprep.subr.bf16.mxu1 %v823_v7  ;;  %v820_v10 = vld [vmem:[%s978_s0 + $0x28] sm:$0xff]   ;;  %v821_v12 = vld [vmem:[%s978_s0 + $0x30] sm:$0xff]   ;;  %v827_v13 = vld [vmem:[#allocation2 + $0x18] sm:$0xff]  }
  0x12   :  { %732 = vmatmul.mubr.msk.bf16.vlgmr.msra.gmra.mxu0 %vm105_vm1, %v816_v3  ;;  %748 = vmatpush3.bf16.msra.mxu1 %v823_v7  ;;  %v822_v14 = vld [vmem:[%s978_s0 + $0x38] sm:$0xff]   ;;  %v828_v15 = vld [vmem:[#allocation2 + $0x10] sm:$0xff]   ;;  %v829_v16 = vld [vmem:[#allocation2 + $0x8] sm:$0xff]  }
  0x13   :  { %735 = vmatprep.mubr.msk.bf16.mxu0 %vm105_vm1, %v817_v4  ;;  %749 = vmatprep.subr.bf16.mxu1 %v824_v8  ;;  %v830_v17 = vld [vmem:[#allocation2] sm:$0xff]   ;;  %v831_v18 = vld [vmem:[%s983_s5 + $0x38] sm:$0xff]   ;;  %v832_v19 = vld [vmem:[%s983_s5 + $0x30] sm:$0xff]  }
  0x14   :  { %779 = vmatprep.subr.bf16.mxu0 %v831_v18  ;;  %v833_v20 = vld [vmem:[%s983_s5 + $0x28] sm:$0xff]   ;;  %v834_v21 = vld [vmem:[%s983_s5 + $0x20] sm:$0xff]   ;;  %v835_v22 = vld [vmem:[%s983_s5 + $0x18] sm:$0xff]  }
  0x15   :  { %780 = vmatpush3.bf16.msra.mxu0 %v831_v18  ;;  %v653_v25 = vld [vmem:[%s980_s2] ss:$0 sm:$0xff] }
  0x16   :  { %750 = vmatpush3.bf16.msra.mxu1 %v824_v8  ;;  %781 = vmatprep.subr.bf16.mxu0 %v832_v19  ;;  %v838_v18 = vld [vmem:[%s983_s5] sm:$0xff]  }
  0x17   :  { %751 = vmatprep.subr.bf16.mxu1 %v825_v9 }
  0x19   :  { %782 = vmatpush3.bf16.msra.mxu0 %v832_v19 }
  0x1a   :  { %736 = vmatmul.mubr.msk.bf16.gmra.mxu0 %vm105_vm1, %v818_v5  ;;  %752 = vmatpush3.bf16.msra.mxu1 %v825_v9 }
  0x1b   :  { %739 = vmatprep.mubr.msk.bf16.mxu0 %vm105_vm1, %v819_v6  ;;  %753 = vmatprep.subr.bf16.mxu1 %v826_v11 }
  0x1c   :  { %783 = vmatprep.subr.bf16.mxu0 %v833_v20 }
  0x1d   :  { %784 = vmatpush3.bf16.msra.mxu0 %v833_v20 }
  0x1e   :  { %754 = vmatpush3.bf16.msra.mxu1 %v826_v11  ;;  %785 = vmatprep.subr.bf16.mxu0 %v834_v21 }
  0x1f   :  { %755 = vmatprep.subr.bf16.mxu1 %v827_v13 }
  0x21   :  { %786 = vmatpush3.bf16.msra.mxu0 %v834_v21  ;;  %v670_v21 = vld [vmem:[%s982_s4] ss:$0 sm:$0xff] }
  0x22   :  { %740 = vmatmul.mubr.msk.bf16.gmra.mxu0 %vm105_vm1, %v820_v10  ;;  %756 = vmatpush3.bf16.msra.mxu1 %v827_v13 }
  0x23   :  { %743 = vmatprep.mubr.msk.bf16.mxu0 %vm105_vm1, %v821_v12  ;;  %757 = vmatprep.subr.bf16.mxu1 %v828_v15 }
  0x24   :  { %787 = vmatprep.subr.bf16.mxu0 %v835_v22 }
  0x25   :  { %788 = vmatpush3.bf16.msra.mxu0 %v835_v22 }
  0x26   :  { %758 = vmatpush3.bf16.msra.mxu1 %v828_v15 }
  0x27   :  { %759 = vmatprep.subr.bf16.mxu1 %v829_v16 }
  0x2a   :  { %744 = vmatmul.mubr.msk.bf16.gmra.mxu0 %vm105_vm1, %v822_v14  ;;  %760 = vmatpush3.bf16.msra.mxu1 %v829_v16  ;;  %v836_v16 = vld [vmem:[%s983_s5 + $0x10] sm:$0xff]  }
  0x2b   :  { %761 = vmatprep.subr.bf16.mxu1 %v830_v17  ;;  %789 = vmatprep.subr.bf16.mxu0 %v836_v16 }
  0x2c   :  { %790 = vmatpush3.bf16.msra.mxu0 %v836_v16 }
  0x2e   :  { %762 = vmatpush3.bf16.msra.mxu1 %v830_v17  ;;  %v837_v17 = vld [vmem:[%s983_s5 + $0x8] sm:$0xff]  }
  0x2f   :  { %791 = vmatprep.subr.bf16.mxu0 %v837_v17 }
  0x30   :  { %792 = vmatpush3.bf16.msra.mxu0 %v837_v17 }
  0x31   :  { %793 = vmatprep.subr.bf16.mxu0 %v838_v18 }
  0x34   :  { %794 = vmatpush3.bf16.msra.mxu0 %v838_v18 }
  0xd2   :  { %v733_v23 = vpop.f32.mrf.mxu0 }
  0xd3   :  { %v177_v29 = vadd.f32 %v733_v23, %v653_v25 }
  0xd4   :  { %v168_v24 = vpop.f32.mrf.mxu0 }
  0xd5   :  { %v169_v27 = vadd.f32 %v653_v25, %v168_v24  ;;  %v233_v36 = vmax.f32 %v177_v29, 0.0 }
  0xd6   :  { %v734_v26 = vpop.f32.mrf.mxu0 }
  0xd7   :  { %v180_v28 = vadd.f32 %v734_v26, %v653_v25  ;;  %v231_v34 = vmax.f32 %v169_v27, 0.0 }
  0xd8   :  { %v171_v30 = vpop.f32.mrf.mxu0 }
  0xd9   :  { %v172_v31 = vadd.f32 %v653_v25, %v171_v30  ;;  %v234_v32 = vmax.f32 %v180_v28, 0.0 }
  0xda   :  { %v737_v33 = vpop.f32.mrf.mxu0 }
  0xdb   :  { %v232_v35 = vmax.f32 %v172_v31, 0.0  ;;  %v193_v37 = vadd.f32 %v737_v33, %v653_v25  ;;  %v248_v41 = vpack.c.bf16 %v234_v32, %v233_v36 }
  0xdc   :  { %v184_v38 = vpop.f32.mrf.mxu0 }
  0xdd   :  { %v185_v39 = vadd.f32 %v653_v25, %v184_v38  ;;  %v247_v40 = vpack.c.bf16 %v232_v35, %v231_v34  ;;  %v237_v44 = vmax.f32 %v193_v37, 0.0 }
  0xde   :  { %v738_v42 = vpop.f32.mrf.mxu0 }
  0xdf   :  { %v196_v43 = vadd.f32 %v738_v42, %v653_v25  ;;  %763 = vmatprep.mubr.bf16.mxu1 %v247_v40  ;;  %v235_v46 = vmax.f32 %v185_v39, 0.0 }
  0xe0   :  { %v187_v45 = vpop.f32.mrf.mxu0  ;;  %764 = vmatmul.mubr.bf16.vlgmr.msra.gmra.mxu1 %v248_v41 }
  0xe1   :  { %v238_v47 = vmax.f32 %v196_v43, 0.0  ;;  %v188_v48 = vadd.f32 %v653_v25, %v187_v45 }
  0xe2   :  { %v741_v49 = vpop.f32.mrf.mxu0 }
  0xe3   :  { %v236_v50 = vmax.f32 %v188_v48, 0.0  ;;  %v250_v51 = vpack.c.bf16 %v238_v47, %v237_v44  ;;  %v209_v52 = vadd.f32 %v741_v49, %v653_v25 }
  0xe4   :  { %v200_v53 = vpop.f32.mrf.mxu0 }
  0xe5   :  { %v249_v54 = vpack.c.bf16 %v236_v50, %v235_v46  ;;  %v201_v55 = vadd.f32 %v653_v25, %v200_v53  ;;  %v241_v58 = vmax.f32 %v209_v52, 0.0 }
  0xe6   :  { %v742_v56 = vpop.f32.mrf.mxu0 }
  0xe7   :  { %v212_v57 = vadd.f32 %v742_v56, %v653_v25  ;;  %767 = vmatprep.mubr.bf16.mxu1 %v249_v54  ;;  %v239_v60 = vmax.f32 %v201_v55, 0.0 }
  0xe8   :  { %v203_v59 = vpop.f32.mrf.mxu0  ;;  %768 = vmatmul.mubr.bf16.gmra.mxu1 %v250_v51 }
  0xe9   :  { %v242_v61 = vmax.f32 %v212_v57, 0.0  ;;  %v204_v62 = vadd.f32 %v653_v25, %v203_v59 }
  0xea   :  { %v745_v63 = vpop.f32.mrf.mxu0 }
  0xeb   :  { %v240_v0 = vmax.f32 %v204_v62, 0.0  ;;  %v252_v1 = vpack.c.bf16 %v242_v61, %v241_v58  ;;  %v225_v2 = vadd.f32 %v745_v63, %v653_v25 }
  0xec   :  { %v216_v3 = vpop.f32.mrf.mxu0 }
  0xed   :  { %v251_v4 = vpack.c.bf16 %v240_v0, %v239_v60  ;;  %v217_v5 = vadd.f32 %v653_v25, %v216_v3  ;;  %v245_v8 = vmax.f32 %v225_v2, 0.0 }
  0xee   :  { %v746_v6 = vpop.f32.mrf.mxu0 }
  0xef   :  { %771 = vmatprep.mubr.bf16.mxu1 %v251_v4  ;;  %v228_v7 = vadd.f32 %v746_v6, %v653_v25  ;;  %v243_v10 = vmax.f32 %v217_v5, 0.0 }
  0xf0   :  { %772 = vmatmul.mubr.bf16.gmra.mxu1 %v252_v1  ;;  %v219_v9 = vpop.f32.mrf.mxu0 }
  0xf1   :  { %v246_v11 = vmax.f32 %v228_v7, 0.0  ;;  %v220_v12 = vadd.f32 %v653_v25, %v219_v9 }
  0xf3   :  { %v244_v13 = vmax.f32 %v220_v12, 0.0  ;;  %v254_v14 = vpack.c.bf16 %v246_v11, %v245_v8 }
  0xf5   :  { %v253_v15 = vpack.c.bf16 %v244_v13, %v243_v10  ;;  %v679_v13 = vld [vmem:[%s984_s6] ss:$0 sm:$0xff] }
  0xf7   :  { %775 = vmatprep.mubr.bf16.mxu1 %v253_v15 }
  0xf8   :  { %776 = vmatmul.mubr.bf16.gmra.mxu1 %v254_v14 }
 0x1a0   :  { %v765_v19 = vpop.f32.mrf.mxu1 }
 0x1a1   :  { %v369_v25 = vadd.f32 %v765_v19, %v670_v21 }
 0x1a2   :  { %v360_v20 = vpop.f32.mrf.mxu1 }
 0x1a3   :  { %v361_v23 = vadd.f32 %v670_v21, %v360_v20  ;;  %v425_v32 = vmax.f32 %v369_v25, 0.0 }
 0x1a4   :  { %v766_v22 = vpop.f32.mrf.mxu1 }
 0x1a5   :  { %v372_v24 = vadd.f32 %v766_v22, %v670_v21  ;;  %v423_v30 = vmax.f32 %v361_v23, 0.0 }
 0x1a6   :  { %v363_v26 = vpop.f32.mrf.mxu1 }
 0x1a7   :  { %v364_v27 = vadd.f32 %v670_v21, %v363_v26  ;;  %v426_v28 = vmax.f32 %v372_v24, 0.0 }
 0x1a8   :  { %v769_v29 = vpop.f32.mrf.mxu1 }
 0x1a9   :  { %v424_v31 = vmax.f32 %v364_v27, 0.0  ;;  %v440_v35 = vpack.c.bf16 %v426_v28, %v425_v32  ;;  %v385_v39 = vadd.f32 %v769_v29, %v670_v21 }
 0x1aa   :  { %v376_v33 = vpop.f32.mrf.mxu1 }
 0x1ab   :  { %v439_v34 = vpack.c.bf16 %v424_v31, %v423_v30  ;;  %v377_v37 = vadd.f32 %v670_v21, %v376_v33  ;;  %v429_v46 = vmax.f32 %v385_v39, 0.0 }
 0x1ac   :  { %v770_v36 = vpop.f32.mrf.mxu1 }
 0x1ad   :  { %v388_v38 = vadd.f32 %v770_v36, %v670_v21  ;;  %795 = vmatprep.mubr.bf16.mxu0 %v439_v34  ;;  %v427_v44 = vmax.f32 %v377_v37, 0.0 }
 0x1ae   :  { %v379_v40 = vpop.f32.mrf.mxu1  ;;  %796 = vmatmul.mubr.bf16.vlgmr.msra.gmra.mxu0 %v440_v35 }
 0x1af   :  { %v380_v41 = vadd.f32 %v670_v21, %v379_v40  ;;  %v430_v42 = vmax.f32 %v388_v38, 0.0 }
 0x1b0   :  { %v773_v43 = vpop.f32.mrf.mxu1 }
 0x1b1   :  { %v428_v45 = vmax.f32 %v380_v41, 0.0  ;;  %v401_v47 = vadd.f32 %v773_v43, %v670_v21  ;;  %v442_v51 = vpack.c.bf16 %v430_v42, %v429_v46 }
 0x1b2   :  { %v392_v48 = vpop.f32.mrf.mxu1 }
 0x1b3   :  { %v441_v49 = vpack.c.bf16 %v428_v45, %v427_v44  ;;  %v393_v50 = vadd.f32 %v670_v21, %v392_v48  ;;  %v433_v54 = vmax.f32 %v401_v47, 0.0 }
 0x1b4   :  { %v774_v52 = vpop.f32.mrf.mxu1 }
 0x1b5   :  { %v404_v53 = vadd.f32 %v774_v52, %v670_v21  ;;  %799 = vmatprep.mubr.bf16.mxu0 %v441_v49  ;;  %v431_v56 = vmax.f32 %v393_v50, 0.0 }
 0x1b6   :  { %v395_v55 = vpop.f32.mrf.mxu1  ;;  %800 = vmatmul.mubr.bf16.gmra.mxu0 %v442_v51 }
 0x1b7   :  { %v434_v57 = vmax.f32 %v404_v53, 0.0  ;;  %v396_v58 = vadd.f32 %v670_v21, %v395_v55 }
 0x1b8   :  { %v777_v59 = vpop.f32.mrf.mxu1 }
 0x1b9   :  { %v432_v60 = vmax.f32 %v396_v58, 0.0  ;;  %v444_v61 = vpack.c.bf16 %v434_v57, %v433_v54  ;;  %v417_v62 = vadd.f32 %v777_v59, %v670_v21 }
 0x1ba   :  { %v408_v63 = vpop.f32.mrf.mxu1 }
 0x1bb   :  { %v443_v0 = vpack.c.bf16 %v432_v60, %v431_v56  ;;  %v409_v1 = vadd.f32 %v670_v21, %v408_v63  ;;  %v437_v4 = vmax.f32 %v417_v62, 0.0 }
 0x1bc   :  { %v778_v2 = vpop.f32.mrf.mxu1 }
 0x1bd   :  { %803 = vmatprep.mubr.bf16.mxu0 %v443_v0  ;;  %v420_v3 = vadd.f32 %v778_v2, %v670_v21  ;;  %v435_v6 = vmax.f32 %v409_v1, 0.0 }
 0x1be   :  { %804 = vmatmul.mubr.bf16.gmra.mxu0 %v444_v61  ;;  %v411_v5 = vpop.f32.mrf.mxu1 }
 0x1bf   :  { %v438_v7 = vmax.f32 %v420_v3, 0.0  ;;  %v412_v8 = vadd.f32 %v670_v21, %v411_v5 }
 0x1c1   :  { %v436_v9 = vmax.f32 %v412_v8, 0.0  ;;  %v446_v10 = vpack.c.bf16 %v438_v7, %v437_v4 }
 0x1c3   :  { %v445_v11 = vpack.c.bf16 %v436_v9, %v435_v6 }
 0x1c5   :  { %807 = vmatprep.mubr.bf16.mxu0 %v445_v11 }
 0x1c6   :  { %808 = vmatmul.mubr.bf16.gmra.mxu0 %v446_v10 }
 0x26e   :  { %v797_v12 = vpop.f32.mrf.mxu0 }
 0x26f   :  { %v561_v20 = vadd.f32 %v797_v12, %v679_v13 }
 0x270   :  { %v552_v14 = vpop.f32.mrf.mxu0 }
 0x271   :  { %v553_v15 = vadd.f32 %v679_v13, %v552_v14 }
 0x272   :  { %v798_v16 = vpop.f32.mrf.mxu0 }
 0x273   :  { %615 = vxpose.xlu0.b32.start [1/16] (narrow) %v553_v15, 8  ;;  %v564_v22 = vadd.f32 %v798_v16, %v679_v13 }
 0x274   :  { %v555_v17 = vpop.f32.mrf.mxu0 }
 0x275   :  { %v556_v18 = vadd.f32 %v679_v13, %v555_v17 }
 0x276   :  { %v801_v19 = vpop.f32.mrf.mxu0 }
 0x277   :  { %616 = vxpose.xlu0.b32.cont [2/16] (narrow) %v556_v18, 8  ;;  %v577_v28 = vadd.f32 %v801_v19, %v679_v13 }
 0x278   :  { %v568_v21 = vpop.f32.mrf.mxu0 }
 0x279   :  { %v569_v24 = vadd.f32 %v679_v13, %v568_v21 }
 0x27a   :  { %v802_v23 = vpop.f32.mrf.mxu0 }
 0x27b   :  { %617 = vxpose.xlu0.b32.cont [3/16] (narrow) %v561_v20, 8  ;;  %v580_v30 = vadd.f32 %v802_v23, %v679_v13 }
 0x27c   :  { %v571_v25 = vpop.f32.mrf.mxu0 }
 0x27d   :  { %v572_v26 = vadd.f32 %v679_v13, %v571_v25 }
 0x27e   :  { %v805_v27 = vpop.f32.mrf.mxu0 }
 0x27f   :  { %618 = vxpose.xlu0.b32.cont [4/16] (narrow) %v564_v22, 8  ;;  %v593_v36 = vadd.f32 %v805_v27, %v679_v13 }
 0x280   :  { %v584_v29 = vpop.f32.mrf.mxu0 }
 0x281   :  { %v585_v32 = vadd.f32 %v679_v13, %v584_v29 }
 0x282   :  { %v806_v31 = vpop.f32.mrf.mxu0 }
 0x283   :  { %619 = vxpose.xlu0.b32.cont [5/16] (narrow) %v569_v24, 8  ;;  %v596_v38 = vadd.f32 %v806_v31, %v679_v13 }
 0x284   :  { %v587_v33 = vpop.f32.mrf.mxu0 }
 0x285   :  { %v588_v34 = vadd.f32 %v679_v13, %v587_v33 }
 0x286   :  { %v809_v35 = vpop.f32.mrf.mxu0 }
 0x287   :  { %620 = vxpose.xlu0.b32.cont [6/16] (narrow) %v572_v26, 8  ;;  %v609_v43 = vadd.f32 %v809_v35, %v679_v13 }
 0x288   :  { %v600_v37 = vpop.f32.mrf.mxu0 }
 0x289   :  { %v601_v40 = vadd.f32 %v679_v13, %v600_v37 }
 0x28a   :  { %v810_v39 = vpop.f32.mrf.mxu0 }
 0x28b   :  { %621 = vxpose.xlu0.b32.cont [7/16] (narrow) %v577_v28, 8  ;;  %v612_v44 = vadd.f32 %v810_v39, %v679_v13 }
 0x28c   :  { %v603_v41 = vpop.f32.mrf.mxu0 }
 0x28d   :  { %v604_v42 = vadd.f32 %v679_v13, %v603_v41 }
 0x28f   :  { %622 = vxpose.xlu0.b32.cont [8/16] (narrow) %v580_v30, 8 }
 0x293   :  { %623 = vxpose.xlu0.b32.cont [9/16] (narrow) %v585_v32, 8 }
 0x297   :  { %624 = vxpose.xlu0.b32.cont [10/16] (narrow) %v588_v34, 8 }
 0x29b   :  { %625 = vxpose.xlu0.b32.cont [11/16] (narrow) %v593_v36, 8 }
 0x29f   :  { %626 = vxpose.xlu0.b32.cont [12/16] (narrow) %v596_v38, 8 }
 0x2a3   :  { %627 = vxpose.xlu0.b32.cont [13/16] (narrow) %v601_v40, 8 }
 0x2a7   :  { %628 = vxpose.xlu0.b32.cont [14/16] (narrow) %v604_v42, 8 }
 0x2ab   :  { %629 = vxpose.xlu0.b32.cont [15/16] (narrow) %v609_v43, 8 }
 0x2af   :  { %630 = vxpose.xlu0.b32.end [16/16] (narrow) %v612_v44, 8 }
 0x2ef   :  { %v631_v45 = vpop.trf.xlu0 }
 0x2f0   :  { %647 = vst [vmem:[%s985_s7] sm:$0x3] %v631_v45 }
 0x2f1   :  { %652 = vsyncpa [#allocation3], 1 }

</bundles_post_ra>
